<compile_context>
chip_gen: v5e
topology: v5e:2x2
jax: 0.10.0
libtpu: 0.0.40
codegen_flags: <defaults>
</compile_context>

<pallas_src>
import functools
import math

import jax
import jax.numpy as jnp
from jax.experimental import pallas as pl
from jax.experimental.pallas import tpu as pltpu


def _round_up(x: int, m: int) -> int:
    return ((x + m - 1) // m) * m


# ---------------------------------------------------------------------------
# Kernels
# ---------------------------------------------------------------------------
def _encoder_kernel(x_ref, w_ref, b_ref, o_ref):
    """Full-K path: relu(x @ W + b) for one batch tile (MXU dot, VPU bias+ReLU)."""
    x = x_ref[...]
    w = w_ref[...]
    if x.dtype != w.dtype:
        # bf16-weight path: cast the activation tile in-kernel (no extra HBM pass in the
        # wrapper); f32 accumulation is kept via preferred_element_type.
        x = x.astype(w.dtype)
    # NOTE: default matmul precision is used on purpose; if true-f32 accuracy is required,
    # pass precision=jax.lax.Precision.HIGHEST here *and* in the downstream reference.
    acc = jnp.dot(x, w, preferred_element_type=jnp.float32)
    o_ref[...] = jnp.maximum(acc + b_ref[...], 0.0).astype(o_ref.dtype)


def _encoder_kernel_ktiled(x_ref, w_ref, b_ref, o_ref, acc_ref):
    """K-tiled path (large in_units): f32 VMEM accumulator, init/finalize via pl.when."""
    k = pl.program_id(1)

    @pl.when(k == 0)
    def _():
        acc_ref[...] = jnp.zeros_like(acc_ref)

    x = x_ref[...]
    w = w_ref[...]
    if x.dtype != w.dtype:
        x = x.astype(w.dtype)
    acc_ref[...] += jnp.dot(x, w, preferred_element_type=jnp.float32)

    @pl.when(k == pl.num_programs(1) - 1)
    def _():
        o_ref[...] = jnp.maximum(acc_ref[...] + b_ref[...], 0.0).astype(o_ref.dtype)


# ---------------------------------------------------------------------------
# One-time parameter prep (hoisted OUT of the per-call forward — perf review item #1)
# ---------------------------------------------------------------------------
def prepare_encoder_params(weight, bias, *, compute_dtype=jnp.float32):
    """weight: (latent_dim, in_units) [PyTorch layout]; bias: (latent_dim,).

    Returns (w_t, b2d):
      w_t : (in_units, latent_pad) in compute_dtype — pre-transposed (K on sublane,
            N on lane) and zero-padded so the output block is lane-dense (128 multiple).
      b2d : (1, latent_pad) f32 (added after f32 accumulation).
    Use compute_dtype=jnp.bfloat16 on v6e/v7x to halve W DMA / VMEM and hit native MXU rate.
    """
    latent_dim, _ = weight.shape
    latent_pad = _round_up(latent_dim, 128)
    w_t = jnp.pad(jnp.asarray(weight).T, ((0, 0), (0, latent_pad - latent_dim)))
    w_t = w_t.astype(compute_dtype)
    b2d = jnp.pad(jnp.asarray(bias, jnp.float32), (0, latent_pad - latent_dim))
    return w_t, b2d.reshape(1, latent_pad)


# ---------------------------------------------------------------------------
# Tiling heuristics
# ---------------------------------------------------------------------------
_VMEM_BUDGET = 24 * 1024 * 1024  # conservative vs. 32 MiB default scoped limit (v6e/v7x)


def _pick_block_b(B, latent_pad, x_itemsize, w_itemsize, k_block, tile_cap):
    # Resident estimate: double-buffered x and W tiles + out tile + accumulator + bias.
    fixed = 2 * k_block * latent_pad * w_itemsize + 2 * latent_pad * 4
    per_row = 2 * k_block * x_itemsize + 3 * latent_pad * 4
    avail = max(_VMEM_BUDGET - fixed, 1 << 20)
    tm_max = max(8, (avail // per_row) // 8 * 8)

    if B <= 8:
        tm = 8
    else:
        # >= 2 balanced grid steps so the "parallel" batch axis actually splits across both
        # TensorCores on v7x; per-tile rows capped at tile_cap (roofline sweet spot 512-1024).
        nt = max(2, pl.cdiv(B, tile_cap))
        tm = _round_up(pl.cdiv(B, nt), 8)
    return max(8, min(tm, tm_max))


def _auto_k_tile(in_units, w_itemsize):
    # Tile K only when holding the full-K weight + activation strips resident would strain
    # VMEM; threshold sized for v7x (64 MiB physical / 32 MiB scoped — half of v5e/v6e).
    limit = 4096 if w_itemsize >= 4 else 8192
    if in_units <= limit:
        return None
    for tk in (4096, 2048, 1024, 512, 256, 128):
        if in_units % tk == 0:
            return tk
    return None  # ragged huge K: fall back to full-K block with a smaller batch tile


# ---------------------------------------------------------------------------
# Forward
# ---------------------------------------------------------------------------
@functools.partial(
    jax.jit, static_argnames=("latent_dim", "block_b", "k_tile", "tile_cap")
)
def simple_encoder_forward(x, w_t, b2d, *, latent_dim, block_b=None, k_tile=None,
                           tile_cap=512):
    """relu(flatten(x) @ W^T + b) with pre-prepared (w_t, b2d) from prepare_encoder_params.

    x: (B, *input_shape); w_t: (in_units, latent_pad); b2d: (1, latent_pad).
    """
    B = x.shape[0]
    in_units = math.prod(x.shape[1:])
    k_dim, latent_pad = w_t.shape
    assert k_dim == in_units, (k_dim, in_units)
    assert latent_pad % 128 == 0 and latent_dim <= latent_pad

    # Flatten is a free metadata reshape of a contiguous NCHW input; NO dtype cast here —
    # x is DMA'd as-is and cast to the weight dtype inside the kernel (perf review).
    x_flat = x.reshape(B, in_units)

    x_itemsize = x_flat.dtype.itemsize
    w_itemsize = w_t.dtype.itemsize

    tk = k_tile if k_tile is not None else _auto_k_tile(in_units, w_itemsize)
    if tk is not None and (in_units % tk != 0 or tk % 128 != 0):
        raise ValueError(f"k_tile={tk} must be a multiple of 128 dividing in_units={in_units}")
    k_block = tk if tk is not None else in_units

    tm = block_b if block_b is not None else _pick_block_b(
        B, latent_pad, x_itemsize, w_itemsize, k_block, tile_cap)
    bt = pl.cdiv(B, tm)  # ragged last batch tile handled by Pallas — no jnp.pad copy of x

    cost = pl.CostEstimate(
        flops=2 * B * in_units * latent_pad,
        transcendentals=0,
        bytes_accessed=(B * in_units * x_itemsize
                        + in_units * latent_pad * w_itemsize
                        + latent_pad * 4
                        + B * latent_pad * 4),
    )

    # Explicit scoped-VMEM limit: v5e defaults to 16 MiB even though physical is 128 MiB;
    # clamp at 64 MiB so the same setting is valid on v7x.
    vmem_est = (2 * tm * k_block * x_itemsize
                + 2 * k_block * latent_pad * w_itemsize
                + 2 * tm * latent_pad * 4
                + tm * latent_pad * 4
                + 2 * latent_pad * 4)
    vmem_limit = int(min(max(2 * vmem_est, 32 << 20), 64 << 20))

    out_shape = jax.ShapeDtypeStruct((B, latent_pad), jnp.float32)

    if tk is None:
        # NOTE: the weight block index never changes, so it is only DMA'd once; if VMEM-tight
        # at very large in_units on v7x, drop its double-buffering (pl.Buffered(1)).
        out = pl.pallas_call(
            _encoder_kernel,
            out_shape=out_shape,
            grid_spec=pltpu.PrefetchScalarGridSpec(
                num_scalar_prefetch=0,
                grid=(bt,),
                in_specs=[
                    pl.BlockSpec((tm, in_units), lambda i: (i, 0)),
                    pl.BlockSpec((in_units, latent_pad), lambda i: (0, 0)),
                    pl.BlockSpec((1, latent_pad), lambda i: (0, 0)),
                ],
                out_specs=pl.BlockSpec((tm, latent_pad), lambda i: (i, 0)),
            ),
            compiler_params=pltpu.CompilerParams(
                dimension_semantics=("parallel",),
                vmem_limit_bytes=vmem_limit,
            ),
            cost_estimate=cost,
        )(x_flat, w_t, b2d)
    else:
        out = pl.pallas_call(
            _encoder_kernel_ktiled,
            out_shape=out_shape,
            grid_spec=pltpu.PrefetchScalarGridSpec(
                num_scalar_prefetch=0,
                grid=(bt, in_units // tk),
                in_specs=[
                    pl.BlockSpec((tm, tk), lambda i, k: (i, k)),
                    pl.BlockSpec((tk, latent_pad), lambda i, k: (k, 0)),
                    pl.BlockSpec((1, latent_pad), lambda i, k: (0, 0)),
                ],
                out_specs=pl.BlockSpec((tm, latent_pad), lambda i, k: (i, 0)),
                scratch_shapes=[pltpu.VMEM((tm, latent_pad), jnp.float32)],
            ),
            compiler_params=pltpu.CompilerParams(
                dimension_semantics=("parallel", "arbitrary"),
                vmem_limit_bytes=vmem_limit,
            ),
            cost_estimate=cost,
        )(x_flat, w_t, b2d)

    # Only the column slice back to latent_dim remains (padded lanes are exactly 0 since
    # W and b are zero-padded; padded batch rows no longer exist).
    return out[:, :latent_dim]


if __name__ == "__main__":
    # Module defaults: input_shape=(1, 32, 32), latent_dim=20. Small batch for the demo.
    input_shape = (1, 32, 32)
    latent_dim = 20
    batch = 2
    in_units = input_shape[0] * input_shape[1] * input_shape[2]

    key = jax.random.PRNGKey(0)
    kx, kw, kb = jax.random.split(key, 3)

    # Deterministic parameter init (PyTorch Linear default: U(-1/sqrt(in), 1/sqrt(in))).
    bound = 1.0 / (in_units ** 0.5)
    weight = jax.random.uniform(kw, (latent_dim, in_units), jnp.float32, -bound, bound)
    bias = jax.random.uniform(kb, (latent_dim,), jnp.float32, -bound, bound)
    x = jax.random.normal(kx, (batch,) + input_shape, dtype=jnp.float32)

    # --- one-time parameter prep (outside the per-call path) ---
    w_f32, b_prep = prepare_encoder_params(weight, bias, compute_dtype=jnp.float32)
    w_bf16, _ = prepare_encoder_params(weight, bias, compute_dtype=jnp.bfloat16)

    # Reference in plain JAX (same default matmul precision as the f32 kernel path).
    ref = jnp.maximum(x.reshape(batch, in_units) @ weight.T + bias, 0.0)

    # 1) f32 path.
    out = jax.block_until_ready(
        simple_encoder_forward(x, w_f32, b_prep, latent_dim=latent_dim))
    assert out.shape == (batch, latent_dim)
    assert jnp.allclose(out, ref, atol=1e-5, rtol=1e-5)

    # 2) bf16-weight path (recommended on v6e/v7x): x cast to bf16 in-kernel, f32 accumulation.
    out_bf16 = jax.block_until_ready(
        simple_encoder_forward(x, w_bf16, b_prep, latent_dim=latent_dim))
    assert jnp.allclose(out_bf16, ref, atol=2e-2, rtol=2e-2)

    # 3) K-tiled accumulator path (auto-selected for large in_units); forced here to exercise it.
    out_kt = jax.block_until_ready(
        simple_encoder_forward(x, w_f32, b_prep, latent_dim=latent_dim, k_tile=256))
    assert jnp.allclose(out_kt, ref, atol=1e-5, rtol=1e-5)

    print("KERNEL_OK")
</pallas_src>

<mosaic_0001>
module attributes {stable_mosaic.version = 11 : i64} {
  func.func @_encoder_kernel(%arg0: i32, %arg1: memref<8x1024xf32, #tpu.memory_space<vmem>>, %arg2: memref<1024x128xf32, #tpu.memory_space<vmem>>, %arg3: memref<1x128xf32, #tpu.memory_space<vmem>>, %arg4: memref<8x128xf32, #tpu.memory_space<vmem>>) attributes {dimension_semantics = [#tpu.dimension_semantics<parallel>], iteration_bounds = array<i64: 1>, scalar_prefetch = 0 : i64, scratch_operands = 0 : i64, tpu.core_type = #tpu.core_type<tc>, window_params = [{transform_indices = @transform_0, window_bounds = array<i64: 8, 1024>}, {pipeline_mode = #tpu.pipeline_mode<synchronous>, transform_indices = @transform_1, window_bounds = array<i64: 1024, 128>}, {pipeline_mode = #tpu.pipeline_mode<synchronous>, transform_indices = @transform_2, window_bounds = array<i64: 1, 128>}, {transform_indices = @transform_3, window_bounds = array<i64: 8, 128>}]} {
    %c0 = arith.constant 0 : index
    %c0_0 = arith.constant 0 : index
    %0 = vector.load %arg1[%c0, %c0_0] : memref<8x1024xf32, #tpu.memory_space<vmem>>, vector<8x1024xf32>
    %c0_1 = arith.constant 0 : index
    %c0_2 = arith.constant 0 : index
    %1 = vector.load %arg2[%c0_1, %c0_2] : memref<1024x128xf32, #tpu.memory_space<vmem>>, vector<1024x128xf32>
    %cst = arith.constant dense<0.000000e+00> : vector<8x128xf32>
    %2 = tpu.matmul %0, %1, %cst {dimension_numbers = #tpu.dot_dimension_numbers<[1], [0], [0], [1], [0, 0, 1, 1], [], []>} : vector<8x1024xf32>, vector<1024x128xf32>, vector<8x128xf32> -> vector<8x128xf32>
    %c0_3 = arith.constant 0 : index
    %c0_4 = arith.constant 0 : index
    %3 = vector.load %arg3[%c0_3, %c0_4] : memref<1x128xf32, #tpu.memory_space<vmem>>, vector<1x128xf32>
    %4 = vector.broadcast %3 : vector<1x128xf32> to vector<8x128xf32>
    %5 = arith.addf %2, %4 : vector<8x128xf32>
    %cst_5 = arith.constant 0.000000e+00 : f32
    %6 = vector.broadcast %cst_5 : f32 to vector<8x128xf32>
    %7 = arith.maximumf %5, %6 : vector<8x128xf32>
    %c0_6 = arith.constant 0 : index
    %c0_7 = arith.constant 0 : index
    %8 = vector.load %arg4[%c0_6, %c0_7] : memref<8x128xf32, #tpu.memory_space<vmem>>, vector<8x128xf32>
    tpu.vector_store %arg4[%c0_6, %c0_7], %7 {strides = array<i32>} : memref<8x128xf32, #tpu.memory_space<vmem>>, vector<8x128xf32>,
    return
  }
  func.func @transform_0(%arg0: i32) -> (i32, i32) {
    %c0_i32 = arith.constant 0 : i32
    %c0_i32_0 = arith.constant 0 : i32
    return %arg0, %c0_i32 : i32, i32
  }
  func.func @transform_1(%arg0: i32) -> (i32, i32) {
    %c0_i32 = arith.constant 0 : i32
    %c0_i32_0 = arith.constant 0 : i32
    %c0_i32_1 = arith.constant 0 : i32
    return %c0_i32, %c0_i32_0 : i32, i32
  }
  func.func @transform_2(%arg0: i32) -> (i32, i32) {
    %c0_i32 = arith.constant 0 : i32
    %c0_i32_0 = arith.constant 0 : i32
    %c0_i32_1 = arith.constant 0 : i32
    return %c0_i32, %c0_i32_0 : i32, i32
  }
  func.func @transform_3(%arg0: i32) -> (i32, i32) {
    %c0_i32 = arith.constant 0 : i32
    %c0_i32_0 = arith.constant 0 : i32
    return %arg0, %c0_i32 : i32, i32
  }
}

</mosaic_0001>

<bundles_post_ra>
// kernel: simple_encoder_forward.1
= control target key start
LH: loop header
LB: loop body
LE: loop exit
PB: predicated region body
PF: predicated region fallthrough
CT: control target
= control target key end

     0   :  { %8 = vsyncpa [#allocation3], 0  ;;  %s509_s0 = inlined_call_operand.vmem [shape: f32[2,1024], index: 0, kind: input, shape index: {}]   ;;  %s510_s1 = inlined_call_operand.hbm [shape: f32[1024,128], index: 1, kind: input, shape index: {}]   ;;  %s511_s2 = inlined_call_operand.vmem [shape: f32[1,128], index: 2, kind: input, shape index: {}]   ;;  %s512_s3 = inlined_call_operand.hbm [shape: f32[2,128], index: 3, kind: output, shape index: {}]  }
   0x1   :  { %9 = vsyncpa [#allocation4], 0  ;;  %s16_s14 = sshll.u32 %s510_s1, 4  ;;  %s450_s15 = smov [#allocation2]   ;;  %s17_s14 = int_to_ptr.hbm [resolvable:$true] %s16_s14 }
   0x2   :  { %s18_s16 = sshll.u32 %s450_s15, 4  ;;  %s451_s17 = smov 128   ;;  %s19_s16 = int_to_ptr.vmem [resolvable:$true] %s18_s16 }
   0x3   :  { %s452_s18 = smov 8  }
   0x4   :  { %24 = dma.hbm_to_vmem [thread:$0]  %s17_s14, 16384, %s19_s16, [#allocation3], %s451_s17, %s451_s17, %s452_s18  }
   0x5   :  { %446 = dma.done.wait [#allocation3], 16384  }
   0x6   :  { %447 = vsyncadd [#allocation3], 4294950912  ;;  %v86_v0 = vld [vmem:[#allocation2 + $0x178] sm:$0xff]  ;;  %v85_v2 = vld [vmem:[#allocation2 + $0x170] sm:$0xff] }
   0x7   :  { %v54_v1 = vld [vmem:[#allocation2 + $0x78] sm:$0xff]  ;;  %250 = vmatpush.msra.mxu2 %v86_v0  ;;  %v53_v4 = vld [vmem:[#allocation2 + $0x70] sm:$0xff]  ;;  %v84_v6 = vld [vmem:[#allocation2 + $0x168] sm:$0xff] }
   0x8   :  { %210 = vmatpush.msra.mxu0 %v54_v1  ;;  %v102_v3 = vld [vmem:[#allocation2 + $0x1f8] sm:$0xff]  ;;  %v101_v7 = vld [vmem:[#allocation2 + $0x1f0] sm:$0xff]  ;;  %v52_v8 = vld [vmem:[#allocation2 + $0x68] sm:$0xff] }
   0x9   :  { %v70_v5 = vld [vmem:[#allocation2 + $0xf8] sm:$0xff]  ;;  %270 = vmatpush.msra.mxu3 %v102_v3  ;;  %251 = vmatpush.msra.mxu2 %v85_v2  ;;  %v69_v9 = vld [vmem:[#allocation2 + $0xf0] sm:$0xff]  ;;  %v100_v10 = vld [vmem:[#allocation2 + $0x1e8] sm:$0xff] }
   0xa   :  { %230 = vmatpush.msra.mxu1 %v70_v5  ;;  %211 = vmatpush.msra.mxu0 %v53_v4  ;;  %v83_v11 = vld [vmem:[#allocation2 + $0x160] sm:$0xff]  ;;  %v68_v13 = vld [vmem:[#allocation2 + $0xe8] sm:$0xff]  ;;  %v82_v16 = vld [vmem:[#allocation2 + $0x158] sm:$0xff] }
   0xb   :  { %271 = vmatpush.msra.mxu3 %v101_v7  ;;  %v51_v12 = vld [vmem:[#allocation2 + $0x60] sm:$0xff]  ;;  %252 = vmatpush.msra.mxu2 %v84_v6  ;;  %v50_v17 = vld [vmem:[#allocation2 + $0x58] sm:$0xff]  ;;  %v81_v20 = vld [vmem:[#allocation2 + $0x150] sm:$0xff] }
   0xc   :  { %231 = vmatpush.msra.mxu1 %v69_v9  ;;  %212 = vmatpush.msra.mxu0 %v52_v8  ;;  %v99_v14 = vld [vmem:[#allocation2 + $0x1e0] sm:$0xff]  ;;  %v98_v18 = vld [vmem:[#allocation2 + $0x1d8] sm:$0xff]  ;;  %v49_v21 = vld [vmem:[#allocation2 + $0x50] sm:$0xff] }
   0xd   :  { %v67_v15 = vld [vmem:[#allocation2 + $0xe0] sm:$0xff]  ;;  %272 = vmatpush.msra.mxu3 %v100_v10  ;;  %253 = vmatpush.msra.mxu2 %v83_v11  ;;  %v66_v19 = vld [vmem:[#allocation2 + $0xd8] sm:$0xff]  ;;  %v97_v22 = vld [vmem:[#allocation2 + $0x1d0] sm:$0xff] }
   0xe   :  { %232 = vmatpush.msra.mxu1 %v68_v13  ;;  %213 = vmatpush.msra.mxu0 %v51_v12  ;;  %v65_v23 = vld [vmem:[#allocation2 + $0xd0] sm:$0xff]  ;;  %v80_v24 = vld [vmem:[#allocation2 + $0x148] sm:$0xff]  ;;  %v79_v28 = vld [vmem:[#allocation2 + $0x140] sm:$0xff] }
   0xf   :  { %273 = vmatpush.msra.mxu3 %v99_v14  ;;  %254 = vmatpush.msra.mxu2 %v82_v16  ;;  %v48_v25 = vld [vmem:[#allocation2 + $0x48] sm:$0xff]  ;;  %v47_v29 = vld [vmem:[#allocation2 + $0x40] sm:$0xff]  ;;  %v78_v32 = vld [vmem:[#allocation2 + $0x138] sm:$0xff] }
  0x10   :  { %233 = vmatpush.msra.mxu1 %v67_v15  ;;  %214 = vmatpush.msra.mxu0 %v50_v17  ;;  %v96_v26 = vld [vmem:[#allocation2 + $0x1c8] sm:$0xff]  ;;  %v95_v30 = vld [vmem:[#allocation2 + $0x1c0] sm:$0xff]  ;;  %v46_v33 = vld [vmem:[#allocation2 + $0x38] sm:$0xff] }
  0x11   :  { %274 = vmatpush.msra.mxu3 %v98_v18  ;;  %255 = vmatpush.msra.mxu2 %v81_v20  ;;  %v64_v27 = vld [vmem:[#allocation2 + $0xc8] sm:$0xff]  ;;  %v63_v31 = vld [vmem:[#allocation2 + $0xc0] sm:$0xff]  ;;  %v94_v34 = vld [vmem:[#allocation2 + $0x1b8] sm:$0xff] }
  0x12   :  { %234 = vmatpush.msra.mxu1 %v66_v19  ;;  %215 = vmatpush.msra.mxu0 %v49_v21  ;;  %v62_v35 = vld [vmem:[#allocation2 + $0xb8] sm:$0xff]  ;;  %v77_v36 = vld [vmem:[#allocation2 + $0x130] sm:$0xff]  ;;  %v76_v40 = vld [vmem:[#allocation2 + $0x128] sm:$0xff] }
  0x13   :  { %275 = vmatpush.msra.mxu3 %v97_v22  ;;  %256 = vmatpush.msra.mxu2 %v80_v24  ;;  %v45_v37 = vld [vmem:[#allocation2 + $0x30] sm:$0xff]  ;;  %v44_v41 = vld [vmem:[#allocation2 + $0x28] sm:$0xff]  ;;  %v75_v44 = vld [vmem:[#allocation2 + $0x120] sm:$0xff] }
  0x14   :  { %235 = vmatpush.msra.mxu1 %v65_v23  ;;  %216 = vmatpush.msra.mxu0 %v48_v25  ;;  %v93_v38 = vld [vmem:[#allocation2 + $0x1b0] sm:$0xff]  ;;  %v92_v42 = vld [vmem:[#allocation2 + $0x1a8] sm:$0xff]  ;;  %v43_v45 = vld [vmem:[#allocation2 + $0x20] sm:$0xff] }
  0x15   :  { %276 = vmatpush.msra.mxu3 %v96_v26  ;;  %257 = vmatpush.msra.mxu2 %v79_v28  ;;  %v61_v39 = vld [vmem:[#allocation2 + $0xb0] sm:$0xff]  ;;  %v60_v43 = vld [vmem:[#allocation2 + $0xa8] sm:$0xff]  ;;  %v91_v46 = vld [vmem:[#allocation2 + $0x1a0] sm:$0xff] }
  0x16   :  { %236 = vmatpush.msra.mxu1 %v64_v27  ;;  %217 = vmatpush.msra.mxu0 %v47_v29  ;;  %v59_v47 = vld [vmem:[#allocation2 + $0xa0] sm:$0xff]  ;;  %v74_v48 = vld [vmem:[#allocation2 + $0x118] sm:$0xff]  ;;  %v73_v52 = vld [vmem:[#allocation2 + $0x110] sm:$0xff] }
  0x17   :  { %277 = vmatpush.msra.mxu3 %v95_v30  ;;  %258 = vmatpush.msra.mxu2 %v78_v32  ;;  %v42_v49 = vld [vmem:[#allocation2 + $0x18] sm:$0xff]  ;;  %v41_v53 = vld [vmem:[#allocation2 + $0x10] sm:$0xff]  ;;  %v72_v56 = vld [vmem:[#allocation2 + $0x108] sm:$0xff] }
  0x18   :  { %237 = vmatpush.msra.mxu1 %v63_v31  ;;  %218 = vmatpush.msra.mxu0 %v46_v33  ;;  %v90_v50 = vld [vmem:[#allocation2 + $0x198] sm:$0xff]  ;;  %v89_v54 = vld [vmem:[#allocation2 + $0x190] sm:$0xff]  ;;  %v40_v57 = vld [vmem:[#allocation2 + $0x8] sm:$0xff] }
  0x19   :  { %278 = vmatpush.msra.mxu3 %v94_v34  ;;  %259 = vmatpush.msra.mxu2 %v77_v36  ;;  %v58_v51 = vld [vmem:[#allocation2 + $0x98] sm:$0xff]  ;;  %v57_v55 = vld [vmem:[#allocation2 + $0x90] sm:$0xff]  ;;  %v88_v58 = vld [vmem:[#allocation2 + $0x188] sm:$0xff] }
  0x1a   :  { %238 = vmatpush.msra.mxu1 %v62_v35  ;;  %219 = vmatpush.msra.mxu0 %v45_v37  ;;  %v56_v59 = vld [vmem:[#allocation2 + $0x88] sm:$0xff]  ;;  %v71_v60 = vld [vmem:[#allocation2 + $0x100] sm:$0xff]  ;;  %v150_v62 = vld [vmem:[#allocation2 + $0x378] sm:$0xff] }
  0x1b   :  { %279 = vmatpush.msra.mxu3 %v93_v38  ;;  %260 = vmatpush.msra.mxu2 %v76_v40  ;;  %v39_v61 = vld [vmem:[#allocation2] sm:$0xff]  ;;  %v118_v0 = vld [vmem:[#allocation2 + $0x278] sm:$0xff]  ;;  %v149_v2 = vld [vmem:[#allocation2 + $0x370] sm:$0xff] }
  0x1c   :  { %239 = vmatpush.msra.mxu1 %v61_v39  ;;  %220 = vmatpush.msra.mxu0 %v44_v41  ;;  %v87_v63 = vld [vmem:[#allocation2 + $0x180] sm:$0xff]  ;;  %v166_v1 = vld [vmem:[#allocation2 + $0x3f8] sm:$0xff]  ;;  %v117_v4 = vld [vmem:[#allocation2 + $0x270] sm:$0xff] }
  0x1d   :  { %280 = vmatpush.msra.mxu3 %v92_v42  ;;  %261 = vmatpush.msra.mxu2 %v75_v44  ;;  %v55_v3 = vld [vmem:[#allocation2 + $0x80] sm:$0xff]  ;;  %v134_v5 = vld [vmem:[#allocation2 + $0x2f8] sm:$0xff]  ;;  %v148_v6 = vld [vmem:[#allocation2 + $0x368] sm:$0xff] }
  0x1e   :  { %240 = vmatpush.msra.mxu1 %v60_v43  ;;  %221 = vmatpush.msra.mxu0 %v43_v45  ;;  %v165_v7 = vld [vmem:[#allocation2 + $0x3f0] sm:$0xff]  ;;  %v116_v8 = vld [vmem:[#allocation2 + $0x268] sm:$0xff]  ;;  %v147_v10 = vld [vmem:[#allocation2 + $0x360] sm:$0xff] }
  0x1f   :  { %281 = vmatpush.msra.mxu3 %v91_v46  ;;  %262 = vmatpush.msra.mxu2 %v74_v48  ;;  %v133_v9 = vld [vmem:[#allocation2 + $0x2f0] sm:$0xff]  ;;  %v164_v11 = vld [vmem:[#allocation2 + $0x3e8] sm:$0xff]  ;;  %v115_v12 = vld [vmem:[#allocation2 + $0x260] sm:$0xff] }
  0x20   :  { %241 = vmatpush.msra.mxu1 %v59_v47  ;;  %222 = vmatpush.msra.mxu0 %v42_v49  ;;  %v132_v13 = vld [vmem:[#allocation2 + $0x2e8] sm:$0xff]  ;;  %v31_v14 = vld [vmem:[%s509_s0] sm:$0xff]  ;;  %v163_v18 = vld [vmem:[#allocation2 + $0x3e0] sm:$0xff] }
  0x21   :  { %282 = vmatpush.msra.mxu3 %v90_v50  ;;  %263 = vmatpush.msra.mxu2 %v73_v52  ;;  %v33_v15 = vld [vmem:[%s509_s0 + $0x10] sm:$0xff]  ;;  %v35_v16 = vld [vmem:[%s509_s0 + $0x20] sm:$0xff]  ;;  %179 = vst [vmem:[#allocation1] ss:$4 sm:$0xff] %v31_v14  ;;  %v131_v21 = vld [vmem:[#allocation2 + $0x2e0] sm:$0xff] }
  0x22   :  { %242 = vmatpush.msra.mxu1 %v58_v51  ;;  %223 = vmatpush.msra.mxu0 %v41_v53  ;;  %v146_v17 = vld [vmem:[#allocation2 + $0x358] sm:$0xff]  ;;  %v37_v19 = vld [vmem:[%s509_s0 + $0x30] sm:$0xff]  ;;  %181 = vst [vmem:[#allocation1 + $0x1] ss:$4 sm:$0xff] %v33_v15  ;;  %v145_v22 = vld [vmem:[#allocation2 + $0x350] sm:$0xff] }
  0x23   :  { %283 = vmatpush.msra.mxu3 %v89_v54  ;;  %264 = vmatpush.msra.mxu2 %v72_v56  ;;  %v114_v20 = vld [vmem:[#allocation2 + $0x258] sm:$0xff]  ;;  %183 = vst [vmem:[#allocation1 + $0x2] ss:$4 sm:$0xff] %v35_v16  ;;  %v113_v24 = vld [vmem:[#allocation2 + $0x250] sm:$0xff]  ;;  %v144_v26 = vld [vmem:[#allocation2 + $0x348] sm:$0xff] }
  0x24   :  { %243 = vmatpush.msra.mxu1 %v57_v55  ;;  %224 = vmatpush.msra.mxu0 %v40_v57  ;;  %v162_v23 = vld [vmem:[#allocation2 + $0x3d8] sm:$0xff]  ;;  %185 = vst [vmem:[#allocation1 + $0x3] ss:$4 sm:$0xff] %v37_v19  ;;  %v161_v27 = vld [vmem:[#allocation2 + $0x3d0] sm:$0xff]  ;;  %v112_v28 = vld [vmem:[#allocation2 + $0x248] sm:$0xff] }
  0x25   :  { %284 = vmatpush.msra.mxu3 %v88_v58  ;;  %265 = vmatpush.msra.mxu2 %v71_v60  ;;  %v130_v25 = vld [vmem:[#allocation2 + $0x2d8] sm:$0xff]  ;;  %v129_v29 = vld [vmem:[#allocation2 + $0x2d0] sm:$0xff]  ;;  %v143_v30 = vld [vmem:[#allocation2 + $0x340] sm:$0xff] }
  0x26   :  { %244 = vmatpush.msra.mxu1 %v56_v59  ;;  %225 = vmatpush.msra.mxu0 %v39_v61  ;;  %v160_v31 = vld [vmem:[#allocation2 + $0x3c8] sm:$0xff]  ;;  %v32_v32 = vld [vmem:[%s509_s0 + $0x8] sm:$0xff]  ;;  %v34_v33 = vld [vmem:[%s509_s0 + $0x18] sm:$0xff] }
  0x27   :  { %330 = vmatpush.msrb.mxu2 %v150_v62  ;;  %285 = vmatpush.msra.mxu3 %v87_v63  ;;  %v36_v34 = vld [vmem:[%s509_s0 + $0x28] sm:$0xff]  ;;  %v38_v35 = vld [vmem:[%s509_s0 + $0x38] sm:$0xff]  ;;  %187 = vst [vmem:[#allocation1 + $0x20] ss:$4 sm:$0xff] %v32_v32  ;;  %v128_v37 = vld [vmem:[#allocation2 + $0x2c8] sm:$0xff] }
  0x28   :  { %290 = vmatpush.msrb.mxu0 %v118_v0  ;;  %245 = vmatpush.msra.mxu1 %v55_v3  ;;  %v111_v36 = vld [vmem:[#allocation2 + $0x240] sm:$0xff]  ;;  %189 = vst [vmem:[#allocation1 + $0x21] ss:$4 sm:$0xff] %v34_v33  ;;  %v142_v38 = vld [vmem:[#allocation2 + $0x338] sm:$0xff]  ;;  %v141_v42 = vld [vmem:[#allocation2 + $0x330] sm:$0xff] }
  0x29   :  { %350 = vmatpush.msrb.mxu3 %v166_v1  ;;  %331 = vmatpush.msrb.mxu2 %v149_v2  ;;  %v159_v39 = vld [vmem:[#allocation2 + $0x3c0] sm:$0xff]  ;;  %191 = vst [vmem:[#allocation1 + $0x22] ss:$4 sm:$0xff] %v36_v34  ;;  %v110_v40 = vld [vmem:[#allocation2 + $0x238] sm:$0xff]  ;;  %v109_v44 = vld [vmem:[#allocation2 + $0x230] sm:$0xff] }
  0x2a   :  { %291 = vmatpush.msrb.mxu0 %v117_v4  ;;  %310 = vmatpush.msrb.mxu1 %v134_v5  ;;  %v127_v41 = vld [vmem:[#allocation2 + $0x2c0] sm:$0xff]  ;;  %193 = vst [vmem:[#allocation1 + $0x23] ss:$4 sm:$0xff] %v38_v35  ;;  %v158_v43 = vld [vmem:[#allocation2 + $0x3b8] sm:$0xff]  ;;  %v140_v46 = vld [vmem:[#allocation2 + $0x328] sm:$0xff] }
  0x2b   :  { %332 = vmatpush.msrb.mxu2 %v148_v6  ;;  %351 = vmatpush.msrb.mxu3 %v165_v7  ;;  %v126_v45 = vld [vmem:[#allocation2 + $0x2b8] sm:$0xff]  ;;  %v157_v47 = vld [vmem:[#allocation2 + $0x3b0] sm:$0xff]  ;;  %v108_v48 = vld [vmem:[#allocation2 + $0x228] sm:$0xff] }
  0x2c   :  { %292 = vmatpush.msrb.mxu0 %v116_v8  ;;  %311 = vmatpush.msrb.mxu1 %v133_v9  ;;  %v125_v49 = vld [vmem:[#allocation2 + $0x2b0] sm:$0xff]  ;;  %v139_v50 = vld [vmem:[#allocation2 + $0x320] sm:$0xff]  ;;  %v156_v51 = vld [vmem:[#allocation2 + $0x3a8] sm:$0xff] }
  0x2d   :  { %333 = vmatpush.msrb.mxu2 %v147_v10  ;;  %352 = vmatpush.msrb.mxu3 %v164_v11  ;;  %v196_v52 = vld.sshfl [vmem:[#allocation1 + $0x10] sm:$0xff pattern:$0x73625140]  ;;  %v107_v53 = vld [vmem:[#allocation2 + $0x220] sm:$0xff]  ;;  %v138_v55 = vld [vmem:[#allocation2 + $0x318] sm:$0xff] }
  0x2e   :  { %293 = vmatpush.msrb.mxu0 %v115_v12  ;;  %312 = vmatpush.msrb.mxu1 %v132_v13  ;;  %v124_v54 = vld [vmem:[#allocation2 + $0x2a8] sm:$0xff]  ;;  %v155_v56 = vld [vmem:[#allocation2 + $0x3a0] sm:$0xff]  ;;  %v194_v57 = vld.sshfl [vmem:[#allocation1] sm:$0xff pattern:$0x73625140] }
  0x2f   :  { %334 = vmatpush.msrb.mxu2 %v146_v17  ;;  %353 = vmatpush.msrb.mxu3 %v163_v18  ;;  %v197_v58 = vld.sshfl [vmem:[#allocation1 + $0x18] sm:$0xff pattern:$0x73625140]  ;;  %v106_v59 = vld [vmem:[#allocation2 + $0x218] sm:$0xff]  ;;  %v123_v60 = vld [vmem:[#allocation2 + $0x2a0] sm:$0xff] }
  0x30   :  { %294 = vmatpush.msrb.mxu0 %v114_v20  ;;  %313 = vmatpush.msrb.mxu1 %v131_v21  ;;  %v137_v61 = vld [vmem:[#allocation2 + $0x310] sm:$0xff]  ;;  %v154_v62 = vld [vmem:[#allocation2 + $0x398] sm:$0xff]  ;;  %v195_v63 = vld.sshfl [vmem:[#allocation1 + $0x8] sm:$0xff pattern:$0x73625140] }
  0x31   :  { %335 = vmatpush.msrb.mxu2 %v145_v22  ;;  %354 = vmatpush.msrb.mxu3 %v162_v23  ;;  %v105_v0 = vld [vmem:[#allocation2 + $0x210] sm:$0xff]  ;;  %v122_v1 = vld [vmem:[#allocation2 + $0x298] sm:$0xff]  ;;  %v136_v2 = vld [vmem:[#allocation2 + $0x308] sm:$0xff] }
  0x32   :  { %295 = vmatpush.msrb.mxu0 %v113_v24  ;;  %314 = vmatpush.msrb.mxu1 %v130_v25  ;;  %v153_v3 = vld [vmem:[#allocation2 + $0x390] sm:$0xff]  ;;  %v104_v4 = vld [vmem:[#allocation2 + $0x208] sm:$0xff]  ;;  %v135_v6 = vld [vmem:[#allocation2 + $0x300] sm:$0xff] }
  0x33   :  { %336 = vmatpush.msrb.mxu2 %v144_v26  ;;  %355 = vmatpush.msrb.mxu3 %v161_v27  ;;  %v121_v5 = vld [vmem:[#allocation2 + $0x290] sm:$0xff]  ;;  %v152_v7 = vld [vmem:[#allocation2 + $0x388] sm:$0xff]  ;;  %v103_v9 = vld [vmem:[#allocation2 + $0x200] sm:$0xff] }
  0x34   :  { %296 = vmatpush.msrb.mxu0 %v112_v28  ;;  %315 = vmatpush.msrb.mxu1 %v129_v29  ;;  %v200_v8 = vld.sshfl [vmem:[#allocation1 + $0x30] sm:$0xff pattern:$0x73625140]  ;;  %v151_v11 = vld [vmem:[#allocation2 + $0x380] sm:$0xff]  ;;  %v397_v16 = vld [vmem:[%s511_s2] ss:$0 sm:$0xff] }
  0x35   :  { %337 = vmatpush.msrb.mxu2 %v143_v30  ;;  %356 = vmatpush.msrb.mxu3 %v160_v31  ;;  %v120_v10 = vld [vmem:[#allocation2 + $0x288] sm:$0xff]  ;;  %v198_v12 = vld.sshfl [vmem:[#allocation1 + $0x20] sm:$0xff pattern:$0x73625140]  ;;  %v119_v14 = vld [vmem:[#allocation2 + $0x280] sm:$0xff] }
  0x36   :  { %297 = vmatpush.msrb.mxu0 %v111_v36  ;;  %316 = vmatpush.msrb.mxu1 %v128_v37  ;;  %v201_v13 = vld.sshfl [vmem:[#allocation1 + $0x38] sm:$0xff pattern:$0x73625140]  ;;  %v199_v15 = vld.sshfl [vmem:[#allocation1 + $0x28] sm:$0xff pattern:$0x73625140] }
  0x37   :  { %338 = vmatpush.msrb.mxu2 %v142_v38  ;;  %357 = vmatpush.msrb.mxu3 %v159_v39 }
  0x38   :  { %298 = vmatpush.msrb.mxu0 %v110_v40  ;;  %317 = vmatpush.msrb.mxu1 %v127_v41 }
  0x39   :  { %339 = vmatpush.msrb.mxu2 %v141_v42  ;;  %358 = vmatpush.msrb.mxu3 %v158_v43 }
  0x3a   :  { %299 = vmatpush.msrb.mxu0 %v109_v44  ;;  %318 = vmatpush.msrb.mxu1 %v126_v45 }
  0x3b   :  { %340 = vmatpush.msrb.mxu2 %v140_v46  ;;  %359 = vmatpush.msrb.mxu3 %v157_v47 }
  0x3c   :  { %300 = vmatpush.msrb.mxu0 %v108_v48  ;;  %319 = vmatpush.msrb.mxu1 %v125_v49 }
  0x3d   :  { %341 = vmatpush.msrb.mxu2 %v139_v50  ;;  %360 = vmatpush.msrb.mxu3 %v156_v51 }
  0x3e   :  { %266 = vmatmul.f32.vlgmr.msra.gmra.mxu2 %v196_v52  ;;  %301 = vmatpush.msrb.mxu0 %v107_v53 }
  0x3f   :  { %320 = vmatpush.msrb.mxu1 %v124_v54  ;;  %342 = vmatpush.msrb.mxu2 %v138_v55 }
  0x40   :  { %361 = vmatpush.msrb.mxu3 %v155_v56  ;;  %226 = vmatmul.f32.vlgmr.msra.gmra.mxu0 %v194_v57 }
  0x41   :  { %286 = vmatmul.f32.vlgmr.msra.gmra.mxu3 %v197_v58  ;;  %302 = vmatpush.msrb.mxu0 %v106_v59 }
  0x42   :  { %321 = vmatpush.msrb.mxu1 %v123_v60  ;;  %343 = vmatpush.msrb.mxu2 %v137_v61 }
  0x43   :  { %362 = vmatpush.msrb.mxu3 %v154_v62  ;;  %246 = vmatmul.f32.vlgmr.msra.gmra.mxu1 %v195_v63 }
  0x44   :  { %303 = vmatpush.msrb.mxu0 %v105_v0  ;;  %322 = vmatpush.msrb.mxu1 %v122_v1 }
  0x45   :  { %344 = vmatpush.msrb.mxu2 %v136_v2  ;;  %363 = vmatpush.msrb.mxu3 %v153_v3 }
  0x46   :  { %304 = vmatpush.msrb.mxu0 %v104_v4  ;;  %323 = vmatpush.msrb.mxu1 %v121_v5 }
  0x47   :  { %345 = vmatpush.msrb.mxu2 %v135_v6  ;;  %364 = vmatpush.msrb.mxu3 %v152_v7 }
  0x48   :  { %346 = vmatmul.f32.vlgmr.msrb.gmra.mxu2 %v200_v8  ;;  %305 = vmatpush.msrb.mxu0 %v103_v9 }
  0x49   :  { %324 = vmatpush.msrb.mxu1 %v120_v10  ;;  %365 = vmatpush.msrb.mxu3 %v151_v11 }
  0x4a   :  { %306 = vmatmul.f32.vlgmr.msrb.gmra.mxu0 %v198_v12  ;;  %366 = vmatmul.f32.vlgmr.msrb.gmra.mxu3 %v201_v13 }
  0x4b   :  { %325 = vmatpush.msrb.mxu1 %v119_v14 }
  0x4c   :  { %326 = vmatmul.f32.vlgmr.msrb.gmra.mxu1 %v199_v15 }
  0xbd   :  { %v227_v17 = vpop.f32.mrf.mxu0 }
  0xbe   :  { %v228_v18 = vadd.f32 %v397_v16, %v227_v17 }
  0xc0   :  { %v247_v19 = vpop.f32.mrf.mxu1 }
  0xc1   :  { %v248_v20 = vadd.f32 %v247_v19, %v228_v18  ;;  %v267_v21 = vpop.f32.mrf.mxu2 }
  0xc3   :  { %v268_v22 = vadd.f32 %v267_v21, %v248_v20 }
  0xc4   :  { %v287_v23 = vpop.f32.mrf.mxu3 }
  0xc5   :  { %v288_v24 = vadd.f32 %v287_v23, %v268_v22 }
  0xc7   :  { %v307_v25 = vpop.f32.mrf.mxu0 }
  0xc8   :  { %v308_v26 = vadd.f32 %v307_v25, %v288_v24 }
  0xc9   :  { %v327_v27 = vpop.f32.mrf.mxu1 }
  0xca   :  { %v328_v28 = vadd.f32 %v327_v27, %v308_v26 }
  0xcb   :  { %v347_v29 = vpop.f32.mrf.mxu2 }
  0xcc   :  { %v348_v30 = vadd.f32 %v347_v29, %v328_v28 }
  0xcd   :  { %v367_v31 = vpop.f32.mrf.mxu3 }
  0xce   :  { %v368_v32 = vadd.f32 %v367_v31, %v348_v30 }
  0xd0   :  { %v370_v33 = vmax.f32 %v368_v32, 0.0 }
  0xd2   :  { %371 = vst [vmem:[#allocation5] sm:$0xff] %v370_v33 }
  0xd3   :  { %375 = vsyncadd [#allocation4], 96  ;;  %s378_s9 = sshll.u32 %s512_s3, 4  ;;  %s453_s10 = smov [#allocation5]   ;;  %s379_s9 = int_to_ptr.hbm [resolvable:$true] %s378_s9 }
  0xd4   :  { %s376_s11 = sshll.u32 %s453_s10, 4  ;;  %s454_s12 = smov 32   ;;  %s377_s11 = int_to_ptr.vmem [resolvable:$true] %s376_s11 }
  0xd5   :  { %s455_s13 = smov 2  }
  0xd6   :  { %384 = dma.vmem_to_hbm [thread:$0]  %s377_s11, 32, %s379_s9, [#allocation4], %s454_s12, %s454_s12, %s455_s13  }
  0xd7   :  { %448 = dma.done.wait [#allocation4], 128  }
  0xd8   :  { %449 = vsyncadd [#allocation4], 4294967168 }
  0xd9   :  { %389 = vsyncpa [#allocation3], 1 }
  0xda   :  { %390 = vsyncpa [#allocation4], 1 }

</bundles_post_ra>
